<compile_context>
chip_gen: v7x
topology: tpu7x:2x2x1
jax: 0.10.0
libtpu: 0.0.40
codegen_flags: <defaults>
</compile_context>

<pallas_src>
import functools

import jax
import jax.numpy as jnp
from jax import lax
from jax.experimental import pallas as pl
from jax.experimental.pallas import tpu as pltpu

CONTEXT_SIZE = 2
EMBEDDING_DIM = 10
HIDDEN_DIM = 128
VOCAB_SIZE = 32

TILE_M = 128   # batch rows per grid step (fills MXU sublanes on v5e/v6e/v7x)
LANE = 128     # lane width for the padded output


def ngram_kernel(idx_ref,   # VMEM (TM, CTX)      int32
                 tbl_ref,   # VMEM (V, D)         f32
                 w1_ref,    # VMEM (CTX, D, H)    f32
                 b1_ref,    # VMEM (1, H)         f32
                 w2_ref,    # VMEM (H, VP)        f32
                 b2_ref,    # VMEM (1, VP)        f32
                 out_ref):  # VMEM (TM, VP)       f32
    tm, ctx = idx_ref.shape
    vocab, _ = tbl_ref.shape
    hidden = b1_ref.shape[1]
    vp = out_ref.shape[1]

    ids = idx_ref[...]                     # (TM, CTX)
    tbl = tbl_ref[...]                     # (V, D)
    vocab_iota = lax.broadcasted_iota(jnp.int32, (tm, vocab), 1)

    # Embedding "gather" via one-hot @ table on the MXU; the flattened
    # concat @ W1 becomes a sum of per-token partial matmuls.
    acc = jnp.zeros((tm, hidden), jnp.float32)
    for i in range(ctx):
        onehot = (ids[:, i:i + 1] == vocab_iota).astype(jnp.float32)       # (TM, V)
        emb_i = jnp.dot(onehot, tbl, preferred_element_type=jnp.float32)   # (TM, D)
        acc = acc + jnp.dot(emb_i, w1_ref[i],
                            preferred_element_type=jnp.float32)            # (TM, H)

    # linear1 bias + ReLU, then linear2 into the lane-padded vocab width.
    h = jnp.maximum(acc + b1_ref[...], 0.0)
    logits = (jnp.dot(h, w2_ref[...], preferred_element_type=jnp.float32)
              + b2_ref[...])                                               # (TM, VP)

    # Mask padded vocab lanes out of the softmax normalizer.
    lane = lax.broadcasted_iota(jnp.int32, (tm, vp), 1)
    logits = jnp.where(lane < vocab, logits, jnp.float32(-1e30))

    # Numerically stable log_softmax over the last axis.
    m = jnp.max(logits, axis=-1, keepdims=True)
    shifted = logits - m
    lse = jnp.log(jnp.sum(jnp.exp(shifted), axis=-1, keepdims=True))
    out_ref[...] = shifted - lse


@functools.partial(jax.jit, static_argnames=("tile_m",))
def ngram_forward_batched(x_idx, emb_table, w1, b1, w2, b2, *, tile_m=TILE_M):
    """x_idx: (B, CONTEXT_SIZE) int token ids -> (B, vocab) log-probabilities."""
    b_in, ctx = x_idx.shape
    vocab, d = emb_table.shape
    hidden = w1.shape[1]

    vp = ((vocab + LANE - 1) // LANE) * LANE           # lane-dense output width
    bp = ((b_in + tile_m - 1) // tile_m) * tile_m      # pad batch to full tiles

    x_pad = jnp.zeros((bp, ctx), jnp.int32).at[:b_in].set(x_idx.astype(jnp.int32))
    w1r = w1.reshape(ctx, d, hidden)                   # per-token W1 slices
    b1r = b1.reshape(1, hidden)
    w2p = jnp.zeros((hidden, vp), jnp.float32).at[:, :vocab].set(w2)
    b2p = jnp.zeros((1, vp), jnp.float32).at[:, :vocab].set(b2.reshape(1, vocab))

    # NOTE: at a realistic vocab the embedding table should stay in HBM
    # (memory_space=pl.ANY) with a DMA/one-hot-tile gather instead of a full
    # VMEM block; at vocab=32 (1.25 KiB) the full-table block is fine on
    # v5e/v6e/v7x.
    grid = (bp // tile_m,)
    out = pl.pallas_call(
        ngram_kernel,
        out_shape=jax.ShapeDtypeStruct((bp, vp), jnp.float32),
        grid_spec=pltpu.PrefetchScalarGridSpec(
            num_scalar_prefetch=0,
            grid=grid,
            in_specs=[
                pl.BlockSpec((tile_m, ctx), lambda b: (b, 0)),       # token ids
                pl.BlockSpec((vocab, d), lambda b: (0, 0)),          # emb table
                pl.BlockSpec((ctx, d, hidden), lambda b: (0, 0, 0)),  # W1 slices
                pl.BlockSpec((1, hidden), lambda b: (0, 0)),         # b1
                pl.BlockSpec((hidden, vp), lambda b: (0, 0)),        # W2 (padded)
                pl.BlockSpec((1, vp), lambda b: (0, 0)),             # b2 (padded)
            ],
            out_specs=pl.BlockSpec((tile_m, vp), lambda b: (b, 0)),
        ),
        compiler_params=pltpu.CompilerParams(
            dimension_semantics=("parallel",)),   # batch axis -> 2 TCs on v7x
    )(x_pad, emb_table, w1r, b1r, w2p, b2p)

    return out[:b_in, :vocab]


def ngram_forward(x_idx, emb_table, w1, b1, w2, b2):
    """Single-context forward matching NgramModel.forward: (ctx,) -> (1, vocab)."""
    return ngram_forward_batched(x_idx.reshape(1, -1), emb_table, w1, b1, w2, b2)


def reference_forward_batched(x_idx, emb_table, w1, b1, w2, b2):
    emb = emb_table[x_idx].reshape(x_idx.shape[0], -1)
    h = jnp.maximum(emb @ w1 + b1, 0.0)
    logits = h @ w2 + b2
    return jax.nn.log_softmax(logits, axis=-1)


if __name__ == "__main__":
    key = jax.random.PRNGKey(0)
    k_emb, k_w1, k_b1, k_w2, k_b2, k_x = jax.random.split(key, 6)

    # Deterministic synthetic parameters (shapes from NgramModel.__init__).
    emb_table = jax.random.normal(k_emb, (VOCAB_SIZE, EMBEDDING_DIM), jnp.float32)
    w1 = jax.random.normal(k_w1, (CONTEXT_SIZE * EMBEDDING_DIM, HIDDEN_DIM),
                           jnp.float32) * 0.1
    b1 = jax.random.normal(k_b1, (1, HIDDEN_DIM), jnp.float32) * 0.1
    w2 = jax.random.normal(k_w2, (HIDDEN_DIM, VOCAB_SIZE), jnp.float32) * 0.1
    b2 = jax.random.normal(k_b2, (1, VOCAB_SIZE), jnp.float32) * 0.1

    # A small batch of contexts (padded internally to the 128-row tile).
    BATCH = 200
    x_idx = jax.random.randint(k_x, (BATCH, CONTEXT_SIZE), 0, VOCAB_SIZE, jnp.int32)

    # Batched forward through the Pallas kernel.
    out = ngram_forward_batched(x_idx, emb_table, w1, b1, w2, b2)
    out = jax.block_until_ready(out)
    ref = reference_forward_batched(x_idx, emb_table, w1, b1, w2, b2)
    assert out.shape == (BATCH, VOCAB_SIZE)
    assert jnp.allclose(out, ref, atol=1e-4, rtol=1e-4), (out, ref)

    # Single-context path (exact NgramModel.forward semantics: (1, vocab)).
    out1 = ngram_forward(x_idx[0], emb_table, w1, b1, w2, b2)
    out1 = jax.block_until_ready(out1)
    ref1 = reference_forward_batched(x_idx[:1], emb_table, w1, b1, w2, b2)
    assert out1.shape == (1, VOCAB_SIZE)
    assert jnp.allclose(out1, ref1, atol=1e-4, rtol=1e-4), (out1, ref1)

    print("KERNEL_OK")
</pallas_src>

<mosaic_0001>
module attributes {stable_mosaic.version = 11 : i64} {
  func.func @ngram_kernel(%arg0: i32, %arg1: memref<128x2xi32, #tpu.memory_space<vmem>>, %arg2: memref<32x10xf32, #tpu.memory_space<vmem>>, %arg3: memref<2x10x128xf32, #tpu.memory_space<vmem>>, %arg4: memref<1x128xf32, #tpu.memory_space<vmem>>, %arg5: memref<128x128xf32, #tpu.memory_space<vmem>>, %arg6: memref<1x128xf32, #tpu.memory_space<vmem>>, %arg7: memref<128x128xf32, #tpu.memory_space<vmem>>) attributes {dimension_semantics = [#tpu.dimension_semantics<parallel>], iteration_bounds = array<i64: 2>, scalar_prefetch = 0 : i64, scratch_operands = 0 : i64, tpu.core_type = #tpu.core_type<tc>, window_params = [{transform_indices = @transform_0, window_bounds = array<i64: 128, 2>}, {pipeline_mode = #tpu.pipeline_mode<synchronous>, transform_indices = @transform_1, window_bounds = array<i64: 32, 10>}, {pipeline_mode = #tpu.pipeline_mode<synchronous>, transform_indices = @transform_2, window_bounds = array<i64: 2, 10, 128>}, {pipeline_mode = #tpu.pipeline_mode<synchronous>, transform_indices = @transform_3, window_bounds = array<i64: 1, 128>}, {pipeline_mode = #tpu.pipeline_mode<synchronous>, transform_indices = @transform_4, window_bounds = array<i64: 128, 128>}, {pipeline_mode = #tpu.pipeline_mode<synchronous>, transform_indices = @transform_5, window_bounds = array<i64: 1, 128>}, {transform_indices = @transform_6, window_bounds = array<i64: 128, 128>}]} {
    %c0 = arith.constant 0 : index
    %c0_0 = arith.constant 0 : index
    %0 = vector.load %arg1[%c0, %c0_0] : memref<128x2xi32, #tpu.memory_space<vmem>>, vector<128x2xi32>
    %c0_1 = arith.constant 0 : index
    %c0_2 = arith.constant 0 : index
    %1 = vector.load %arg2[%c0_1, %c0_2] : memref<32x10xf32, #tpu.memory_space<vmem>>, vector<32x10xf32>
    %2 = tpu.iota {dimensions = array<i32: 1>} : vector<128x32xi32>
    %cst = arith.constant 0.000000e+00 : f32
    %3 = vector.broadcast %cst : f32 to vector<128x128xf32>
    %4 = vector.extract_strided_slice %0 {offsets = [0, 0], sizes = [128, 1], strides = [1, 1]} : vector<128x2xi32> to vector<128x1xi32>
    %5 = vector.broadcast %4 : vector<128x1xi32> to vector<128x32xi32>
    %6 = arith.cmpi eq, %5, %2 : vector<128x32xi32>
    %7 = arith.extui %6 : vector<128x32xi1> to vector<128x32xi32>
    %8 = arith.sitofp %7 : vector<128x32xi32> to vector<128x32xf32>
    %cst_3 = arith.constant dense<0.000000e+00> : vector<128x10xf32>
    %9 = tpu.matmul %8, %1, %cst_3 {dimension_numbers = #tpu.dot_dimension_numbers<[1], [0], [0], [1], [0, 0, 1, 1], [], []>} : vector<128x32xf32>, vector<32x10xf32>, vector<128x10xf32> -> vector<128x10xf32>
    %c0_4 = arith.constant 0 : index
    %c0_5 = arith.constant 0 : index
    %c0_6 = arith.constant 0 : index
    %10 = vector.load %arg3[%c0_4, %c0_5, %c0_6] : memref<2x10x128xf32, #tpu.memory_space<vmem>>, vector<1x10x128xf32>
    %11 = vector.shape_cast %10 : vector<1x10x128xf32> to vector<10x128xf32>
    %cst_7 = arith.constant dense<0.000000e+00> : vector<128x128xf32>
    %12 = tpu.matmul %9, %11, %cst_7 {dimension_numbers = #tpu.dot_dimension_numbers<[1], [0], [0], [1], [0, 0, 1, 1], [], []>} : vector<128x10xf32>, vector<10x128xf32>, vector<128x128xf32> -> vector<128x128xf32>
    %13 = arith.addf %3, %12 : vector<128x128xf32>
    %14 = vector.extract_strided_slice %0 {offsets = [0, 1], sizes = [128, 1], strides = [1, 1]} : vector<128x2xi32> to vector<128x1xi32>
    %15 = vector.broadcast %14 : vector<128x1xi32> to vector<128x32xi32>
    %16 = arith.cmpi eq, %15, %2 : vector<128x32xi32>
    %17 = arith.extui %16 : vector<128x32xi1> to vector<128x32xi32>
    %18 = arith.sitofp %17 : vector<128x32xi32> to vector<128x32xf32>
    %cst_8 = arith.constant dense<0.000000e+00> : vector<128x10xf32>
    %19 = tpu.matmul %18, %1, %cst_8 {dimension_numbers = #tpu.dot_dimension_numbers<[1], [0], [0], [1], [0, 0, 1, 1], [], []>} : vector<128x32xf32>, vector<32x10xf32>, vector<128x10xf32> -> vector<128x10xf32>
    %c1 = arith.constant 1 : index
    %c0_9 = arith.constant 0 : index
    %c0_10 = arith.constant 0 : index
    %20 = vector.load %arg3[%c1, %c0_9, %c0_10] : memref<2x10x128xf32, #tpu.memory_space<vmem>>, vector<1x10x128xf32>
    %21 = vector.shape_cast %20 : vector<1x10x128xf32> to vector<10x128xf32>
    %cst_11 = arith.constant dense<0.000000e+00> : vector<128x128xf32>
    %22 = tpu.matmul %19, %21, %cst_11 {dimension_numbers = #tpu.dot_dimension_numbers<[1], [0], [0], [1], [0, 0, 1, 1], [], []>} : vector<128x10xf32>, vector<10x128xf32>, vector<128x128xf32> -> vector<128x128xf32>
    %23 = arith.addf %13, %22 : vector<128x128xf32>
    %c0_12 = arith.constant 0 : index
    %c0_13 = arith.constant 0 : index
    %24 = vector.load %arg4[%c0_12, %c0_13] : memref<1x128xf32, #tpu.memory_space<vmem>>, vector<1x128xf32>
    %25 = vector.broadcast %24 : vector<1x128xf32> to vector<128x128xf32>
    %26 = arith.addf %23, %25 : vector<128x128xf32>
    %cst_14 = arith.constant 0.000000e+00 : f32
    %27 = vector.broadcast %cst_14 : f32 to vector<128x128xf32>
    %28 = arith.maximumf %26, %27 : vector<128x128xf32>
    %c0_15 = arith.constant 0 : index
    %c0_16 = arith.constant 0 : index
    %29 = vector.load %arg5[%c0_15, %c0_16] : memref<128x128xf32, #tpu.memory_space<vmem>>, vector<128x128xf32>
    %cst_17 = arith.constant dense<0.000000e+00> : vector<128x128xf32>
    %30 = tpu.matmul %28, %29, %cst_17 {dimension_numbers = #tpu.dot_dimension_numbers<[1], [0], [0], [1], [0, 0, 1, 1], [], []>} : vector<128x128xf32>, vector<128x128xf32>, vector<128x128xf32> -> vector<128x128xf32>
    %c0_18 = arith.constant 0 : index
    %c0_19 = arith.constant 0 : index
    %31 = vector.load %arg6[%c0_18, %c0_19] : memref<1x128xf32, #tpu.memory_space<vmem>>, vector<1x128xf32>
    %32 = vector.broadcast %31 : vector<1x128xf32> to vector<128x128xf32>
    %33 = arith.addf %30, %32 : vector<128x128xf32>
    %34 = tpu.iota {dimensions = array<i32: 1>} : vector<128x128xi32>
    %c32_i32 = arith.constant 32 : i32
    %35 = vector.broadcast %c32_i32 : i32 to vector<128x128xi32>
    %36 = arith.cmpi slt, %34, %35 : vector<128x128xi32>
    %cst_20 = arith.constant -1.000000e+30 : f32
    %37 = vector.broadcast %cst_20 : f32 to vector<128x128xf32>
    %38 = arith.select %36, %33, %37 : vector<128x128xi1>, vector<128x128xf32>
    %cst_21 = arith.constant dense<0xFF800000> : vector<128xf32>
    %39 = vector.multi_reduction <maximumf>, %38, %cst_21 [1] : vector<128x128xf32> to vector<128xf32>
    %40 = vector.shape_cast %39 : vector<128xf32> to vector<128x1xf32>
    %41 = vector.broadcast %40 : vector<128x1xf32> to vector<128x128xf32>
    %42 = arith.subf %38, %41 : vector<128x128xf32>
    %43 = math.exp %42 : vector<128x128xf32>
    %cst_22 = arith.constant dense<0.000000e+00> : vector<128xf32>
    %44 = vector.multi_reduction <add>, %43, %cst_22 [1] : vector<128x128xf32> to vector<128xf32>
    %45 = vector.shape_cast %44 : vector<128xf32> to vector<128x1xf32>
    %46 = math.log %45 : vector<128x1xf32>
    %47 = vector.broadcast %46 : vector<128x1xf32> to vector<128x128xf32>
    %48 = arith.subf %42, %47 : vector<128x128xf32>
    %c0_23 = arith.constant 0 : index
    %c0_24 = arith.constant 0 : index
    %49 = vector.load %arg7[%c0_23, %c0_24] : memref<128x128xf32, #tpu.memory_space<vmem>>, vector<128x128xf32>
    tpu.vector_store %arg7[%c0_23, %c0_24], %48 {strides = array<i32>} : memref<128x128xf32, #tpu.memory_space<vmem>>, vector<128x128xf32>,
    return
  }
  func.func @transform_0(%arg0: i32) -> (i32, i32) {
    %c0_i32 = arith.constant 0 : i32
    %c0_i32_0 = arith.constant 0 : i32
    return %arg0, %c0_i32 : i32, i32
  }
  func.func @transform_1(%arg0: i32) -> (i32, i32) {
    %c0_i32 = arith.constant 0 : i32
    %c0_i32_0 = arith.constant 0 : i32
    %c0_i32_1 = arith.constant 0 : i32
    return %c0_i32, %c0_i32_0 : i32, i32
  }
  func.func @transform_2(%arg0: i32) -> (i32, i32, i32) {
    %c0_i32 = arith.constant 0 : i32
    %c0_i32_0 = arith.constant 0 : i32
    %c0_i32_1 = arith.constant 0 : i32
    %c0_i32_2 = arith.constant 0 : i32
    return %c0_i32, %c0_i32_0, %c0_i32_1 : i32, i32, i32
  }
  func.func @transform_3(%arg0: i32) -> (i32, i32) {
    %c0_i32 = arith.constant 0 : i32
    %c0_i32_0 = arith.constant 0 : i32
    %c0_i32_1 = arith.constant 0 : i32
    return %c0_i32, %c0_i32_0 : i32, i32
  }
  func.func @transform_4(%arg0: i32) -> (i32, i32) {
    %c0_i32 = arith.constant 0 : i32
    %c0_i32_0 = arith.constant 0 : i32
    %c0_i32_1 = arith.constant 0 : i32
    return %c0_i32, %c0_i32_0 : i32, i32
  }
  func.func @transform_5(%arg0: i32) -> (i32, i32) {
    %c0_i32 = arith.constant 0 : i32
    %c0_i32_0 = arith.constant 0 : i32
    %c0_i32_1 = arith.constant 0 : i32
    return %c0_i32, %c0_i32_0 : i32, i32
  }
  func.func @transform_6(%arg0: i32) -> (i32, i32) {
    %c0_i32 = arith.constant 0 : i32
    %c0_i32_0 = arith.constant 0 : i32
    return %arg0, %c0_i32 : i32, i32
  }
}

</mosaic_0001>

<bundles_post_ra>
// kernel: ngram_forward_batched.1
= control target key start
LH: loop header
LB: loop body
LE: loop exit
PB: predicated region body
PF: predicated region fallthrough
CT: control target
= control target key end

     0   :  { %s2318_s21 = smov 0   ;;  %s2743_s0 = inlined_call_operand.vmem [shape: s32[256,2], index: 0, kind: input, shape index: {}]   ;;  %s2744_s1 = inlined_call_operand.vmem [shape: f32[32,10], index: 1, kind: input, shape index: {}]   ;;  %s2745_s2 = inlined_call_operand.vmem [shape: f32[2,10,128], index: 2, kind: input, shape index: {}]   ;;  %s2746_s3 = inlined_call_operand.vmem [shape: f32[1,128], index: 3, kind: input, shape index: {}]   ;;  %s2747_s4 = inlined_call_operand.vmem [shape: f32[128,128], index: 4, kind: input, shape index: {}]   ;;  %s2748_s5 = inlined_call_operand.vmem [shape: f32[1,128], index: 5, kind: input, shape index: {}]   ;;  %s2749_s6 = inlined_call_operand.vmem [shape: f32[256,128], index: 6, kind: output, shape index: {}]  }
   0x1 LB: > { %s1711_s22 = sadd.s32 4294967295, %s2277_s21   ;;  %p1715_p0 = scmp.ge.s32.totalorder %s2277_s21, 1  ;;  %s2277_s21 = sphi %s2318_s21, %s16_s21  }
   0x2   : > { %p213_p1 = scmp.lt.s32.totalorder %s2277_s21, 3 }
   0x4   : > { %p214_p2 = pnand %p1715_p0, %p213_p1 }
   0x5   : > { %s1716_s23 = sshll.u32 (!%p214_p2), %s1711_s22, 4  ;;  %v271_v0 = vld [vmem:[%s2744_s1] sm:$0xff] (!%p214_p2)  ;;  %v272_v1 = vld [vmem:[%s2744_s1 + $0x8] sm:$0xff] (!%p214_p2)  ;;  %v2279_v2 = vmov (!%p214_p2), 0   ;;  %v273_v8 = vld [vmem:[%s2744_s1 + $0x10] sm:$0xff] (!%p214_p2)  ;;  %v2280_v17 = vmov (!%p214_p2), 1   ;;  %v275_v24 = vlaneseq (!%p214_p2) }
   0x6   : > { %217 = sbr.rel (%p214_p2) target bundleno = 1196 (0x4ac), region = 44  ;;  %2201 = vset.pattern.permute.xlu1 (!%p214_p2), %v2279_v2  ;;  %2200 = vset.pattern.permute.xlu0 (!%p214_p2), %v2279_v2  ;;  %p244_p3 = scmp.lt.s32.totalorder (!%p214_p2), %s1716_s23, 31  ;;  %v2334_v3 = vpack.c.bf16 (!%p214_p2), %v272_v1, %v271_v0  ;;  %v274_v9 = vld [vmem:[%s2744_s1 + $0x18] sm:$0xff] (!%p214_p2)  ;;  %vm373_vm0 = vcmask (!%p214_p2), 261120   ;;  %v2281_v28 = vmov (!%p214_p2), 0.0  }
   0x7   : > { %v2362_v12 = vpack.c.bf16 (!%p214_p2), %v274_v9, %v273_v8  ;;  %v2381_v25 = vand.u32 (!%p214_p2), 127, %v275_v24 }
   0x8   : > { %2168 = vmatprep.subr.bf16.mxu1 (!%p214_p2), %v2334_v3  ;;  %2109 = vmatprep.subr.bf16.mxu0 (!%p214_p2), %v2334_v3 }
   0x9   : > { %2170 = vmatpush3.bf16.msra.mxu1 (!%p214_p2), %v2334_v3  ;;  %2111 = vmatpush3.bf16.msra.mxu0 (!%p214_p2), %v2334_v3 }
   0xa   : > { %2169 = vmatprep.subr.bf16.mxu1 (!%p214_p2), %v2362_v12  ;;  %2113 = vmatprep.subr.bf16.mxu0 (!%p214_p2), %v2362_v12 }
   0xd   : > { %s2753_s23 = smov (!%p244_p3, %s1716_s23), 31  ;;  %2171 = vmatpush3.bf16.msra.mxu1 %v2362_v12  ;;  %2115 = vmatpush3.bf16.msra.mxu0 %v2362_v12 }
   0xe   : > { %s1717_s28 = sshll.u32 %s2753_s23, 3  ;;  %2117 = vmatprep.subr.bf16.mxu1 %v2334_v3 }
   0xf   : > { %s2348_s7 = scalar_lea.vmem %s2743_s0, %s1717_s28  ;;  %s2706_s16 = scalar_lea.vmem %s2749_s6, %s1717_s28 }
  0x10   : > { %v265_v4 = vld [vmem:[%s2348_s7 + $0x50] sm:$0xff]  ;;  %v263_v5 = vld [vmem:[%s2348_s7 + $0x40] sm:$0xff]  ;;  %v266_v6 = vld [vmem:[%s2348_s7 + $0x58] sm:$0xff] }
  0x11   : > { %308 = vperm.xlu1 %2201, %v265_v4   ;;  %302 = vperm.xlu0 %2200, %v263_v5   ;;  %v264_v7 = vld [vmem:[%s2348_s7 + $0x48] sm:$0xff]  ;;  %v267_v11 = vld [vmem:[%s2348_s7 + $0x60] sm:$0xff]  ;;  %v270_v13 = vld [vmem:[%s2348_s7 + $0x78] sm:$0xff] }
  0x12   : > { %v268_v10 = vld [vmem:[%s2348_s7 + $0x68] sm:$0xff]  ;;  %v269_v14 = vld [vmem:[%s2348_s7 + $0x70] sm:$0xff]  ;;  %v255_v16 = vld [vmem:[%s2348_s7] sm:$0xff] }
  0x13   : > { %v256_v15 = vld [vmem:[%s2348_s7 + $0x8] sm:$0xff]  ;;  %v257_v18 = vld [vmem:[%s2348_s7 + $0x10] sm:$0xff]  ;;  %v258_v19 = vld [vmem:[%s2348_s7 + $0x18] sm:$0xff] }
  0x14   : > { %v259_v20 = vld [vmem:[%s2348_s7 + $0x20] sm:$0xff]  ;;  %v260_v21 = vld [vmem:[%s2348_s7 + $0x28] sm:$0xff]  ;;  %v261_v22 = vld [vmem:[%s2348_s7 + $0x30] sm:$0xff] }
  0x15   : > { %311 = vperm.xlu1 %2201, %v266_v6   ;;  %305 = vperm.xlu0 %2200, %v264_v7   ;;  %v262_v23 = vld [vmem:[%s2348_s7 + $0x38] sm:$0xff] }
  0x19   : > { %317 = vperm.xlu1 %2201, %v268_v10   ;;  %314 = vperm.xlu0 %2200, %v267_v11  }
  0x1d   : > { %323 = vperm.xlu1 %2201, %v270_v13   ;;  %320 = vperm.xlu0 %2200, %v269_v14  }
  0x21   : > { %2203 = vset.pattern.permute.xlu1 %v2280_v17  ;;  %2202 = vset.pattern.permute.xlu0 %v2280_v17 }
  0x22   : > { %573 = vperm.xlu1 %2203, %v256_v15   ;;  %570 = vperm.xlu0 %2202, %v255_v16  }
  0x26   : > { %576 = vperm.xlu1 %2203, %v257_v18   ;;  %579 = vperm.xlu0 %2202, %v258_v19  }
  0x2a   : > { %582 = vperm.xlu1 %2203, %v259_v20   ;;  %585 = vperm.xlu0 %2202, %v260_v21  }
  0x2e   : > { %588 = vperm.xlu1 %2203, %v261_v22   ;;  %591 = vperm.xlu0 %2202, %v262_v23  }
  0x32   : > { %594 = vperm.xlu1 %2203, %v263_v5   ;;  %597 = vperm.xlu0 %2202, %v264_v7  }
  0x36   : > { %600 = vperm.xlu1 %2203, %v265_v4   ;;  %603 = vperm.xlu0 %2202, %v266_v6  }
  0x3a   : > { %606 = vperm.xlu1 %2203, %v267_v11   ;;  %609 = vperm.xlu0 %2202, %v268_v10  }
  0x3e   : > { %612 = vperm.xlu1 %2203, %v269_v14   ;;  %615 = vperm.xlu0 %2202, %v270_v13  }
  0x42   : > { %2204 = vset.pattern.permute.xlu1 %v2279_v2  ;;  %2205 = vset.pattern.permute.xlu0 %v2279_v2 }
  0x43   : > { %278 = vperm.xlu1 %2204, %v255_v16   ;;  %281 = vperm.xlu0 %2205, %v256_v15  }
  0x47   : > { %284 = vperm.xlu1 %2204, %v257_v18   ;;  %290 = vperm.xlu0 %2205, %v259_v20  }
  0x4b   : > { %287 = vperm.xlu1 %2204, %v258_v19   ;;  %296 = vperm.xlu0 %2205, %v261_v22  }
  0x4f   : > { %293 = vperm.xlu1 %2204, %v260_v21   ;;  %2206 = vset.pattern.permute.xlu0 %v2280_v17 }
  0x53   : > { %299 = vperm.xlu1 %2204, %v262_v23  }
  0x90   : > { %v309_v26 = vpop.permute.xlu1 %308  ;;  %v303_v27 = vpop.permute.xlu0 %302 }
  0x91   : > { %vm333_vm1 = vcmp.eq.s32.totalorder %v303_v27, %v2381_v25  ;;  %vm335_vm2 = vcmp.eq.s32.totalorder %v309_v26, %v2381_v25 }
  0x92   : > { %v1728_v29 = vsel %vm333_vm1, 1.0, %v2281_v28  ;;  %v1730_v33 = vsel %vm335_vm2, 1.0, %v2281_v28 }
  0x93   : > { %1952 = vmatprep.mubr.msk.f32.mxu1 %vm373_vm0, %v1728_v29  ;;  %v1784_v29 = vld [vmem:[%s2745_s2 + $0x10] sm:$0xff] }
  0x94   : > { %v312_v30 = vpop.permute.xlu1 %311  ;;  %v306_v31 = vpop.permute.xlu0 %305 }
  0x95   : > { %vm334_vm3 = vcmp.eq.s32.totalorder %v306_v31, %v2381_v25  ;;  %vm336_vm4 = vcmp.eq.s32.totalorder %v312_v30, %v2381_v25  ;;  %v1785_v30 = vld [vmem:[%s2745_s2 + $0x18] sm:$0x3] }
  0x96   : > { %v1729_v32 = vsel %vm334_vm3, 1.0, %v2281_v28  ;;  %v1731_v36 = vsel %vm336_vm4, 1.0, %v2281_v28  ;;  %v2124_v31 = vpack.c.bf16 %v1785_v30, %v1784_v29  ;;  %v1820_v29 = vld [vmem:[%s2746_s3] ss:$0 sm:$0xff] }
  0x97   : > { %1953 = vmatmul.mubr.msk.f32.vlgmr.msra.gmra.mrb[0].mxu1 %vm373_vm0, %v1729_v32 }
  0x98   : > { %v318_v34 = vpop.permute.xlu1 %317  ;;  %1955 = vmatprep.mubr.msk.f32.mxu1 %vm373_vm0, %v1730_v33  ;;  %2119 = vmatpush3.bf16.msra.mxu1 %v2334_v3  ;;  %v315_v35 = vpop.permute.xlu0 %314  ;;  %v568_v33 = vld [vmem:[%s2745_s2 + $0x8] sm:$0x3] }
  0x99   : > { %vm337_vm5 = vcmp.eq.s32.totalorder %v315_v35, %v2381_v25  ;;  %2121 = vmatprep.subr.bf16.mxu1 %v2362_v12  ;;  %vm338_vm6 = vcmp.eq.s32.totalorder %v318_v34, %v2381_v25  ;;  %v1294_v35 = vld [vmem:[%s2747_s4] sm:$0xff] }
  0x9a   : > { %v1732_v37 = vsel %vm337_vm5, 1.0, %v2281_v28  ;;  %v1733_v40 = vsel %vm338_vm6, 1.0, %v2281_v28 }
  0x9b   : > { %1956 = vmatmul.mubr.msk.f32.gmra.mrb[2].mxu1 %vm373_vm0, %v1731_v36  ;;  %v1295_v36 = vld [vmem:[%s2747_s4 + $0x8] sm:$0xff] }
  0x9c   : > { %v324_v38 = vpop.permute.xlu1 %323  ;;  %1958 = vmatprep.mubr.msk.f32.mxu1 %vm373_vm0, %v1732_v37  ;;  %v321_v39 = vpop.permute.xlu0 %320  ;;  %2123 = vmatpush3.bf16.msra.mxu1 %v2362_v12  ;;  %v1296_v37 = vld [vmem:[%s2747_s4 + $0x10] sm:$0xff] }
  0x9d   : > { %vm339_vm7 = vcmp.eq.s32.totalorder %v321_v39, %v2381_v25  ;;  %vm340_vm8 = vcmp.eq.s32.totalorder %v324_v38, %v2381_v25  ;;  %v2136_v38 = vpack.c.bf16 %v1295_v36, %v1294_v35  ;;  %v1297_v39 = vld [vmem:[%s2747_s4 + $0x18] sm:$0xff] }
  0x9e   : > { %v1734_v41 = vsel %vm339_vm7, 1.0, %v2281_v28  ;;  %v1735_v44 = vsel %vm340_vm8, 1.0, %v2281_v28 }
  0x9f   : > { %1959 = vmatmul.mubr.msk.f32.gmra.mrb[4].mxu1 %vm373_vm0, %v1733_v40  ;;  %v2140_v40 = vpack.c.bf16 %v1297_v39, %v1296_v37  ;;  %2137 = vmatprep.subr.bf16.mxu1 %v2136_v38 }
  0xa0   : > { %1961 = vmatprep.mubr.msk.f32.mxu1 %vm373_vm0, %v1734_v41  ;;  %v1298_v41 = vld [vmem:[%s2747_s4 + $0x20] sm:$0xff] }
  0xa1   : > { %v574_v42 = vpop.permute.xlu1 %573  ;;  %v571_v43 = vpop.permute.xlu0 %570 }
  0xa2   : > { %vm617_vm9 = vcmp.eq.s32.totalorder %v571_v43, %v2381_v25  ;;  %vm618_vm10 = vcmp.eq.s32.totalorder %v574_v42, %v2381_v25  ;;  %v1299_v42 = vld [vmem:[%s2747_s4 + $0x28] sm:$0xff] }
  0xa3   : > { %v1752_v45 = vsel %vm617_vm9, 1.0, %v2281_v28  ;;  %1962 = vmatmul.mubr.msk.f32.gmra.mrb[6].mxu1 %vm373_vm0, %v1735_v44  ;;  %v1753_v48 = vsel %vm618_vm10, 1.0, %v2281_v28  ;;  %v2144_v43 = vpack.c.bf16 %v1299_v42, %v1298_v41  ;;  %v1300_v44 = vld [vmem:[%s2747_s4 + $0x30] sm:$0xff] }
  0xa4   : > { %1972 = vmatprep.mubr.msk.f32.mxu1 %vm373_vm0, %v1752_v45  ;;  %v1301_v45 = vld [vmem:[%s2747_s4 + $0x38] sm:$0xff] }
  0xa5   : > { %v577_v46 = vpop.permute.xlu1 %576  ;;  %v580_v47 = vpop.permute.xlu0 %579 }
  0xa6   : > { %vm619_vm11 = vcmp.eq.s32.totalorder %v577_v46, %v2381_v25  ;;  %vm620_vm12 = vcmp.eq.s32.totalorder %v580_v47, %v2381_v25  ;;  %v2148_v46 = vpack.c.bf16 %v1301_v45, %v1300_v44  ;;  %v1302_v47 = vld [vmem:[%s2747_s4 + $0x40] sm:$0xff] }
  0xa7   : > { %v1754_v49 = vsel %vm619_vm11, 1.0, %v2281_v28  ;;  %1973 = vmatmul.mubr.msk.f32.vlgmr.msra.gmra.mrb[8].mxu1 %vm373_vm0, %v1753_v48  ;;  %v1755_v52 = vsel %vm620_vm12, 1.0, %v2281_v28  ;;  %v1303_v48 = vld [vmem:[%s2747_s4 + $0x48] sm:$0xff] }
  0xa8   : > { %1975 = vmatprep.mubr.msk.f32.mxu1 %vm373_vm0, %v1754_v49  ;;  %2139 = vmatpush3.bf16.msra.mxu1 %v2136_v38  ;;  %v2152_v49 = vpack.c.bf16 %v1303_v48, %v1302_v47 }
  0xa9   : > { %v583_v50 = vpop.permute.xlu1 %582  ;;  %v586_v51 = vpop.permute.xlu0 %585  ;;  %2141 = vmatprep.subr.bf16.mxu1 %v2140_v40 }
  0xaa   : > { %vm621_vm13 = vcmp.eq.s32.totalorder %v583_v50, %v2381_v25  ;;  %vm622_vm14 = vcmp.eq.s32.totalorder %v586_v51, %v2381_v25  ;;  %v1304_v50 = vld [vmem:[%s2747_s4 + $0x50] sm:$0xff]  ;;  %v1305_v51 = vld [vmem:[%s2747_s4 + $0x58] sm:$0xff] }
  0xab   : > { %v1756_v53 = vsel %vm621_vm13, 1.0, %v2281_v28  ;;  %1976 = vmatmul.mubr.msk.f32.gmra.mrb[10].mxu1 %vm373_vm0, %v1755_v52  ;;  %v1757_v56 = vsel %vm622_vm14, 1.0, %v2281_v28  ;;  %v2156_v52 = vpack.c.bf16 %v1305_v51, %v1304_v50 }
  0xac   : > { %1978 = vmatprep.mubr.msk.f32.mxu1 %vm373_vm0, %v1756_v53  ;;  %2143 = vmatpush3.bf16.msra.mxu1 %v2140_v40  ;;  %v1306_v53 = vld [vmem:[%s2747_s4 + $0x60] sm:$0xff] }
  0xad   : > { %v589_v54 = vpop.permute.xlu1 %588  ;;  %v592_v55 = vpop.permute.xlu0 %591  ;;  %2145 = vmatprep.subr.bf16.mxu1 %v2144_v43 }
  0xae   : > { %vm623_vm15 = vcmp.eq.s32.totalorder %v589_v54, %v2381_v25  ;;  %vm624_vm1 = vcmp.eq.s32.totalorder %v592_v55, %v2381_v25  ;;  %v1307_v54 = vld [vmem:[%s2747_s4 + $0x68] sm:$0xff] }
  0xaf   : > { %v1758_v57 = vsel %vm623_vm15, 1.0, %v2281_v28  ;;  %1979 = vmatmul.mubr.msk.f32.gmra.mrb[12].mxu1 %vm373_vm0, %v1757_v56  ;;  %v1759_v60 = vsel %vm624_vm1, 1.0, %v2281_v28  ;;  %v2160_v55 = vpack.c.bf16 %v1307_v54, %v1306_v53 }
  0xb0   : > { %1981 = vmatprep.mubr.msk.f32.mxu1 %vm373_vm0, %v1758_v57  ;;  %2147 = vmatpush3.bf16.msra.mxu1 %v2144_v43 }
  0xb1   : > { %v595_v58 = vpop.permute.xlu1 %594  ;;  %v598_v59 = vpop.permute.xlu0 %597  ;;  %2149 = vmatprep.subr.bf16.mxu1 %v2148_v46 }
  0xb2   : > { %vm625_vm2 = vcmp.eq.s32.totalorder %v595_v58, %v2381_v25  ;;  %vm626_vm3 = vcmp.eq.s32.totalorder %v598_v59, %v2381_v25 }
  0xb3   : > { %v1760_v61 = vsel %vm625_vm2, 1.0, %v2281_v28  ;;  %1982 = vmatmul.mubr.msk.f32.gmra.mrb[14].mxu1 %vm373_vm0, %v1759_v60  ;;  %v1761_v0 = vsel %vm626_vm3, 1.0, %v2281_v28  ;;  %vm910_vm3 = vcmask 1041408  }
  0xb4   : > { %1984 = vmatprep.mubr.msk.f32.mxu1 %vm373_vm0, %v1760_v61  ;;  %2151 = vmatpush3.bf16.msra.mxu1 %v2148_v46 }
  0xb5   : > { %v601_v62 = vpop.permute.xlu1 %600  ;;  %v604_v63 = vpop.permute.xlu0 %603  ;;  %2153 = vmatprep.subr.bf16.mxu1 %v2152_v49 }
  0xb6   : > { %vm627_vm4 = vcmp.eq.s32.totalorder %v601_v62, %v2381_v25  ;;  %vm628_vm5 = vcmp.eq.s32.totalorder %v604_v63, %v2381_v25 }
  0xb7   : > { %v1762_v1 = vsel %vm627_vm4, 1.0, %v2281_v28  ;;  %1985 = vmatmul.mubr.msk.f32.gmra.mrb[16].mxu1 %vm373_vm0, %v1761_v0  ;;  %v1763_v4 = vsel %vm628_vm5, 1.0, %v2281_v28  ;;  %vm2282_vm4 = vmmov 1  }
  0xb8   : > { %1987 = vmatprep.mubr.msk.f32.mxu1 %vm373_vm0, %v1762_v1  ;;  %vm2488_vm5 = vmpackc.low %vm910_vm3, %vm2282_vm4  ;;  %2155 = vmatpush3.bf16.msra.mxu1 %v2152_v49 }
  0xb9   : > { %v607_v2 = vpop.permute.xlu1 %606  ;;  %v610_v3 = vpop.permute.xlu0 %609  ;;  %2126 = vmatprep.subr.msk.bf16.mxu0 %vm2488_vm5, %v2124_v31  ;;  %2157 = vmatprep.subr.bf16.mxu1 %v2156_v52 }
  0xba   : > { %vm629_vm6 = vcmp.eq.s32.totalorder %v607_v2, %v2381_v25  ;;  %vm630_vm7 = vcmp.eq.s32.totalorder %v610_v3, %v2381_v25 }
  0xbb   : > { %v1764_v5 = vsel %vm629_vm6, 1.0, %v2281_v28  ;;  %1988 = vmatmul.mubr.msk.f32.gmra.mrb[18].mxu1 %vm373_vm0, %v1763_v4  ;;  %v1765_v8 = vsel %vm630_vm7, 1.0, %v2281_v28  ;;  %vm1462_vm6 = vcmp.lt.s32.totalorder %v2381_v25, 32 }
  0xbc   : > { %1990 = vmatprep.mubr.msk.f32.mxu1 %vm373_vm0, %v1764_v5  ;;  %2159 = vmatpush3.bf16.msra.mxu1 %v2156_v52 }
  0xbd   : > { %v613_v6 = vpop.permute.xlu1 %612  ;;  %v616_v7 = vpop.permute.xlu0 %615  ;;  %2161 = vmatprep.subr.bf16.mxu1 %v2160_v55 }
  0xbe   : > { %vm631_vm8 = vcmp.eq.s32.totalorder %v613_v6, %v2381_v25  ;;  %vm632_vm9 = vcmp.eq.s32.totalorder %v616_v7, %v2381_v25 }
  0xbf   : > { %v1766_v9 = vsel %vm631_vm8, 1.0, %v2281_v28  ;;  %1991 = vmatmul.mubr.msk.f32.gmra.mrb[20].mxu1 %vm373_vm0, %v1765_v8  ;;  %v1767_v10 = vsel %vm632_vm9, 1.0, %v2281_v28 }
  0xc0   : > { %1993 = vmatprep.mubr.msk.f32.mxu1 %vm373_vm0, %v1766_v9  ;;  %2163 = vmatpush3.bf16.msra.mxu1 %v2160_v55 }
  0xc2   : > { %v279_v11 = vpop.permute.xlu1 %278  ;;  %v282_v12 = vpop.permute.xlu0 %281 }
  0xc3   : > { %vm325_vm10 = vcmp.eq.s32.totalorder %v279_v11, %v2381_v25  ;;  %vm326_vm11 = vcmp.eq.s32.totalorder %v282_v12, %v2381_v25  ;;  %1994 = vmatmul.mubr.msk.f32.gmra.mrb[22].mxu1 %vm373_vm0, %v1767_v10 }
  0xc4   : > { %v1721_v13 = vsel %vm326_vm11, 1.0, %v2281_v28  ;;  %v1720_v14 = vsel %vm325_vm10, 1.0, %v2281_v28 }
  0xc5   : > { %1940 = vmatprep.mubr.msk.f32.mxu0 %vm373_vm0, %v1720_v14 }
  0xc6   : > { %v285_v15 = vpop.permute.xlu1 %284  ;;  %v291_v16 = vpop.permute.xlu0 %290  ;;  %1941 = vmatmul.mubr.msk.f32.vlgmr.msra.gmra.mrb[0].mxu0 %vm373_vm0, %v1721_v13 }
  0xc7   : > { %vm327_vm12 = vcmp.eq.s32.totalorder %v285_v15, %v2381_v25  ;;  %vm329_vm13 = vcmp.eq.s32.totalorder %v291_v16, %v2381_v25  ;;  %2129 = vmatpush3.bf16.msk.msra.mxu0 %vm2488_vm5, %v2124_v31 }
  0xc8   : > { %v1722_v17 = vsel %vm327_vm12, 1.0, %v2281_v28  ;;  %v1724_v21 = vsel %vm329_vm13, 1.0, %v2281_v28 }
  0xc9   : > { %1943 = vmatprep.mubr.msk.f32.mxu0 %vm373_vm0, %v1722_v17 }
  0xca   : > { %v288_v18 = vpop.permute.xlu1 %287  ;;  %v297_v19 = vpop.permute.xlu0 %296 }
  0xcb   : > { %vm328_vm14 = vcmp.eq.s32.totalorder %v288_v18, %v2381_v25  ;;  %vm331_vm15 = vcmp.eq.s32.totalorder %v297_v19, %v2381_v25 }
  0xcc   : > { %v1723_v20 = vsel %vm328_vm14, 1.0, %v2281_v28  ;;  %v1726_v24 = vsel %vm331_vm15, 1.0, %v2281_v28 }
  0xcd   : > { %1944 = vmatmul.mubr.msk.f32.gmra.mrb[2].mxu0 %vm373_vm0, %v1723_v20 }
  0xce   : > { %v294_v22 = vpop.permute.xlu1 %293  ;;  %1946 = vmatprep.mubr.msk.f32.mxu0 %vm373_vm0, %v1724_v21 }
  0xcf   : > { %vm330_vm1 = vcmp.eq.s32.totalorder %v294_v22, %v2381_v25 }
  0xd0   : > { %v1725_v23 = vsel %vm330_vm1, 1.0, %v2281_v28 }
  0xd1   : > { %1947 = vmatmul.mubr.msk.f32.gmra.mrb[4].mxu0 %vm373_vm0, %v1725_v23 }
  0xd2   : > { %v300_v26 = vpop.permute.xlu1 %299  ;;  %1949 = vmatprep.mubr.msk.f32.mxu0 %vm373_vm0, %v1726_v24  ;;  %v1308_v24 = vld [vmem:[%s2747_s4 + $0x70] sm:$0xff] }
  0xd3   : > { %vm332_vm2 = vcmp.eq.s32.totalorder %v300_v26, %v2381_v25  ;;  %v1309_v26 = vld [vmem:[%s2747_s4 + $0x78] sm:$0xff] }
  0xd4   : > { %v1727_v27 = vsel %vm332_vm2, 1.0, %v2281_v28  ;;  %v567_v28 = vld [vmem:[%s2745_s2] sm:$0xff] }
  0xd5   : > { %1950 = vmatmul.mubr.msk.f32.gmra.mrb[6].mxu0 %vm373_vm0, %v1727_v27  ;;  %v2130_v34 = vpack.c.bf16 %v568_v33, %v567_v28  ;;  %vm861_vm0 = vcmask 80896   ;;  %v2164_v27 = vpack.c.bf16 %v1309_v26, %v1308_v24 }
  0xd7   : > { %2132 = vmatprep.subr.msk.bf16.mxu0 %vm2488_vm5, %v2130_v34  ;;  %2165 = vmatprep.subr.bf16.mxu1 %v2164_v27 }
  0xd8   : > { %2167 = vmatpush3.bf16.msra.mxu1 %v2164_v27 }
 0x16a   : > { %v1954_v56 = vpop.f32.mrb[0].mxu1 }
 0x16b   : > { %v528_v57 = vpop.f32.mrb[1].mxu1 }
 0x16e   : > { %v1957_v58 = vpop.f32.mrb[2].mxu1 }
 0x16f   : > { %v538_v59 = vpop.f32.mrb[3].mxu1 }
 0x172   : > { %v1960_v60 = vpop.f32.mrb[4].mxu1 }
 0x173   : > { %v548_v61 = vpop.f32.mrb[5].mxu1 }
 0x176   : > { %v1963_v62 = vpop.f32.mrb[6].mxu1 }
 0x177   : > { %v558_v63 = vpop.f32.mrb[7].mxu1 }
 0x17a   : > { %v1974_v0 = vpop.f32.mrb[8].mxu1 }
 0x17b   : > { %v779_v1 = vpop.f32.mrb[9].mxu1 }
 0x17c   : > { %2000 = vmatprep.mubr.msk.f32.mxu0 %vm861_vm0, %v779_v1 }
 0x17d   : > { %2001 = vmatmul.mubr.msk.f32.vlgmr.msra.gmra.mrb[8].mxu0 %vm861_vm0, %v1974_v0 }
 0x17e   : > { %v1977_v2 = vpop.f32.mrb[10].mxu1  ;;  %2135 = vmatpush3.bf16.msk.msra.mxu0 %vm2488_vm5, %v2130_v34 }
 0x17f   : > { %v789_v3 = vpop.f32.mrb[11].mxu1 }
 0x180   : > { %2003 = vmatprep.mubr.msk.f32.mxu0 %vm861_vm0, %v789_v3 }
 0x181   : > { %2004 = vmatmul.mubr.msk.f32.gmra.mrb[10].mxu0 %vm861_vm0, %v1977_v2 }
 0x182   : > { %v1980_v4 = vpop.f32.mrb[12].mxu1 }
 0x183   : > { %v799_v5 = vpop.f32.mrb[13].mxu1 }
 0x184   : > { %2006 = vmatprep.mubr.msk.f32.mxu0 %vm861_vm0, %v799_v5 }
 0x185   : > { %2007 = vmatmul.mubr.msk.f32.gmra.mrb[12].mxu0 %vm861_vm0, %v1980_v4 }
 0x186   : > { %v1983_v6 = vpop.f32.mrb[14].mxu1 }
 0x187   : > { %v809_v7 = vpop.f32.mrb[15].mxu1 }
 0x188   : > { %2009 = vmatprep.mubr.msk.f32.mxu0 %vm861_vm0, %v809_v7 }
 0x189   : > { %2010 = vmatmul.mubr.msk.f32.gmra.mrb[14].mxu0 %vm861_vm0, %v1983_v6 }
 0x18a   : > { %v1986_v8 = vpop.f32.mrb[16].mxu1 }
 0x18b   : > { %v819_v9 = vpop.f32.mrb[17].mxu1 }
 0x18c   : > { %2012 = vmatprep.mubr.msk.f32.mxu0 %vm861_vm0, %v819_v9 }
 0x18d   : > { %2013 = vmatmul.mubr.msk.f32.gmra.mrb[16].mxu0 %vm861_vm0, %v1986_v8 }
 0x18e   : > { %v1989_v10 = vpop.f32.mrb[18].mxu1 }
 0x18f   : > { %v829_v11 = vpop.f32.mrb[19].mxu1 }
 0x190   : > { %2015 = vmatprep.mubr.msk.f32.mxu0 %vm861_vm0, %v829_v11 }
 0x191   : > { %2016 = vmatmul.mubr.msk.f32.gmra.mrb[18].mxu0 %vm861_vm0, %v1989_v10 }
 0x192   : > { %v1992_v12 = vpop.f32.mrb[20].mxu1 }
 0x193   : > { %v839_v13 = vpop.f32.mrb[21].mxu1 }
 0x194   : > { %2018 = vmatprep.mubr.msk.f32.mxu0 %vm861_vm0, %v839_v13  ;;  %v1821_v13 = vld [vmem:[%s2748_s5] ss:$0 sm:$0xff] }
 0x195   : > { %2019 = vmatmul.mubr.msk.f32.gmra.mrb[20].mxu0 %vm861_vm0, %v1992_v12 }
 0x196   : > { %v1995_v14 = vpop.f32.mrb[22].mxu1 }
 0x197   : > { %v849_v15 = vpop.f32.mrb[23].mxu1 }
 0x198   : > { %2021 = vmatprep.mubr.msk.f32.mxu0 %vm861_vm0, %v849_v15 }
 0x199   : > { %2022 = vmatmul.mubr.msk.f32.gmra.mrb[22].mxu0 %vm861_vm0, %v1995_v14  ;;  %v1942_v16 = vpop.f32.mrb[0].mxu0 }
 0x19a   : > { %v488_v17 = vpop.f32.mrb[1].mxu0 }
 0x19b   : > { %2028 = vmatprep.mubr.msk.f32.mxu0 %vm861_vm0, %v488_v17 }
 0x19d   : > { %2029 = vmatmul.mubr.msk.f32.vlgmr.msra.gmra.mrb[8].mxu0 %vm861_vm0, %v1942_v16 }
 0x1a0   : > { %v1945_v18 = vpop.f32.mrb[2].mxu0 }
 0x1a1   : > { %v498_v19 = vpop.f32.mrb[3].mxu0 }
 0x1a2   : > { %2031 = vmatprep.mubr.msk.f32.mxu0 %vm861_vm0, %v498_v19 }
 0x1a3   : > { %2032 = vmatmul.mubr.msk.f32.gmra.mrb[10].mxu0 %vm861_vm0, %v1945_v18 }
 0x1a4   : > { %v1948_v20 = vpop.f32.mrb[4].mxu0 }
 0x1a5   : > { %v508_v21 = vpop.f32.mrb[5].mxu0 }
 0x1a6   : > { %2034 = vmatprep.mubr.msk.f32.mxu0 %vm861_vm0, %v508_v21 }
 0x1a7   : > { %2035 = vmatmul.mubr.msk.f32.gmra.mrb[12].mxu0 %vm861_vm0, %v1948_v20 }
 0x1a8   : > { %v1951_v22 = vpop.f32.mrb[6].mxu0 }
 0x1a9   : > { %v518_v23 = vpop.f32.mrb[7].mxu0 }
 0x1aa   : > { %2037 = vmatprep.mubr.msk.f32.mxu0 %vm861_vm0, %v518_v23 }
 0x1ab   : > { %2038 = vmatmul.mubr.msk.f32.gmra.mrb[14].mxu0 %vm861_vm0, %v1951_v22 }
 0x1ac   : > { %2040 = vmatprep.mubr.msk.f32.mxu0 %vm861_vm0, %v528_v57 }
 0x1af   : > { %2041 = vmatmul.mubr.msk.f32.gmra.mrb[16].mxu0 %vm861_vm0, %v1954_v56 }
 0x1b0   : > { %2043 = vmatprep.mubr.msk.f32.mxu0 %vm861_vm0, %v538_v59 }
 0x1b3   : > { %2044 = vmatmul.mubr.msk.f32.gmra.mrb[18].mxu0 %vm861_vm0, %v1957_v58 }
 0x1b4   : > { %2046 = vmatprep.mubr.msk.f32.mxu0 %vm861_vm0, %v548_v61 }
 0x1b7   : > { %2047 = vmatmul.mubr.msk.f32.gmra.mrb[20].mxu0 %vm861_vm0, %v1960_v60 }
 0x1b8   : > { %2049 = vmatprep.mubr.msk.f32.mxu0 %vm861_vm0, %v558_v63 }
 0x1bb   : > { %2050 = vmatmul.mubr.msk.f32.gmra.mrb[22].mxu0 %vm861_vm0, %v1963_v62 }
 0x270   : > { %v2030_v30 = vpop.f32.mrb[8].mxu0 }
 0x271   : > { %v1263_v31 = vadd.f32 %v2030_v30, %v1820_v29  ;;  %v1176_v32 = vpop.f32.mrb[9].mxu0 }
 0x272   : > { %v1262_v28 = vadd.f32 %v1820_v29, %v1176_v32 }
 0x273   : > { %v1279_v34 = vmax.f32 %v1263_v31, 0.0 }
 0x274   : > { %v1278_v33 = vmax.f32 %v1262_v28, 0.0 }
 0x276   : > { %v2033_v35 = vpop.f32.mrb[10].mxu0  ;;  %2084 = vmatprep.mubr.f32.mxu1 %v1278_v33 }
 0x277   : > { %v1265_v36 = vadd.f32 %v2033_v35, %v1820_v29  ;;  %v1186_v37 = vpop.f32.mrb[11].mxu0  ;;  %2085 = vmatmul.mubr.f32.vlgmr.msra.gmra.mrb[24].mxu1 %v1279_v34 }
 0x278   : > { %v1264_v38 = vadd.f32 %v1820_v29, %v1186_v37 }
 0x279   : > { %v1281_v41 = vmax.f32 %v1265_v36, 0.0 }
 0x27a   : > { %v1280_v39 = vmax.f32 %v1264_v38, 0.0  ;;  %v2036_v40 = vpop.f32.mrb[12].mxu0 }
 0x27b   : > { %v1267_v42 = vadd.f32 %v2036_v40, %v1820_v29  ;;  %v1196_v43 = vpop.f32.mrb[13].mxu0 }
 0x27c   : > { %v1266_v44 = vadd.f32 %v1820_v29, %v1196_v43  ;;  %2087 = vmatprep.mubr.f32.mxu1 %v1280_v39 }
 0x27d   : > { %2088 = vmatmul.mubr.f32.gmra.mrb[26].mxu1 %v1281_v41  ;;  %v1283_v47 = vmax.f32 %v1267_v42, 0.0 }
 0x27e   : > { %v1282_v45 = vmax.f32 %v1266_v44, 0.0  ;;  %v2039_v46 = vpop.f32.mrb[14].mxu0 }
 0x27f   : > { %v1269_v48 = vadd.f32 %v2039_v46, %v1820_v29  ;;  %v1206_v49 = vpop.f32.mrb[15].mxu0 }
 0x280   : > { %v1268_v50 = vadd.f32 %v1820_v29, %v1206_v49  ;;  %2090 = vmatprep.mubr.f32.mxu1 %v1282_v45 }
 0x281   : > { %2091 = vmatmul.mubr.f32.gmra.mrb[28].mxu1 %v1283_v47  ;;  %v1285_v53 = vmax.f32 %v1269_v48, 0.0 }
 0x282   : > { %v1284_v51 = vmax.f32 %v1268_v50, 0.0  ;;  %v2042_v52 = vpop.f32.mrb[16].mxu0 }
 0x283   : > { %v1271_v54 = vadd.f32 %v2042_v52, %v1820_v29  ;;  %v1216_v55 = vpop.f32.mrb[17].mxu0 }
 0x284   : > { %v1270_v56 = vadd.f32 %v1820_v29, %v1216_v55  ;;  %2093 = vmatprep.mubr.f32.mxu1 %v1284_v51 }
 0x285   : > { %2094 = vmatmul.mubr.f32.gmra.mrb[30].mxu1 %v1285_v53  ;;  %v1287_v59 = vmax.f32 %v1271_v54, 0.0 }
 0x286   : > { %v1286_v57 = vmax.f32 %v1270_v56, 0.0  ;;  %v2045_v58 = vpop.f32.mrb[18].mxu0 }
 0x287   : > { %v1273_v60 = vadd.f32 %v2045_v58, %v1820_v29  ;;  %v1226_v61 = vpop.f32.mrb[19].mxu0 }
 0x288   : > { %v1272_v62 = vadd.f32 %v1820_v29, %v1226_v61  ;;  %2096 = vmatprep.mubr.f32.mxu1 %v1286_v57 }
 0x289   : > { %2097 = vmatmul.mubr.f32.gmra.mrb[32].mxu1 %v1287_v59  ;;  %v1289_v1 = vmax.f32 %v1273_v60, 0.0 }
 0x28a   : > { %v1288_v63 = vmax.f32 %v1272_v62, 0.0  ;;  %v2048_v0 = vpop.f32.mrb[20].mxu0 }
 0x28b   : > { %v1275_v2 = vadd.f32 %v2048_v0, %v1820_v29  ;;  %v1236_v3 = vpop.f32.mrb[21].mxu0 }
 0x28c   : > { %v1274_v4 = vadd.f32 %v1820_v29, %v1236_v3  ;;  %2099 = vmatprep.mubr.f32.mxu1 %v1288_v63 }
 0x28d   : > { %2100 = vmatmul.mubr.f32.gmra.mrb[34].mxu1 %v1289_v1  ;;  %v1291_v7 = vmax.f32 %v1275_v2, 0.0 }
 0x28e   : > { %v1290_v5 = vmax.f32 %v1274_v4, 0.0  ;;  %v2051_v6 = vpop.f32.mrb[22].mxu0 }
 0x28f   : > { %v1277_v8 = vadd.f32 %v2051_v6, %v1820_v29  ;;  %v1246_v9 = vpop.f32.mrb[23].mxu0 }
 0x290   : > { %v1276_v10 = vadd.f32 %v1820_v29, %v1246_v9  ;;  %2102 = vmatprep.mubr.f32.mxu1 %v1290_v5 }
 0x291   : > { %2103 = vmatmul.mubr.f32.gmra.mrb[36].mxu1 %v1291_v7  ;;  %v1293_v12 = vmax.f32 %v1277_v8, 0.0 }
 0x292   : > { %v1292_v11 = vmax.f32 %v1276_v10, 0.0 }
 0x294   : > { %2105 = vmatprep.mubr.f32.mxu1 %v1292_v11 }
 0x295   : > { %2106 = vmatmul.mubr.f32.gmra.mrb[38].mxu1 %v1293_v12 }
 0x34a   : > { %v2086_v14 = vpop.f32.mrb[24].mxu1 }
 0x34b   : > { %v1389_v15 = vadd.f32 %v2086_v14, %v1821_v13  ;;  %v1383_v16 = vpop.f32.mrb[25].mxu1 }
 0x34c   : > { %v1384_v17 = vadd.f32 %v1821_v13, %v1383_v16 }
 0x34d   : > { %v1464_v18 = vsel %vm1462_vm6, %v1389_v15, -1e+30 }
 0x34e   : > { %1481 = vmax.xlane.f32.xlu1 %v1464_v18  ;;  %v1463_v19 = vsel %vm1462_vm6, %v1384_v17, -1e+30 }
 0x34f   : > { %1479 = vmax.xlane.f32.xlu0 %v1463_v19 }
 0x350   : > { %v2089_v20 = vpop.f32.mrb[26].mxu1 }
 0x351   : > { %v1399_v21 = vadd.f32 %v2089_v20, %v1821_v13  ;;  %v1393_v22 = vpop.f32.mrb[27].mxu1 }
 0x352   : > { %v1394_v23 = vadd.f32 %v1821_v13, %v1393_v22 }
 0x353   : > { %v1466_v24 = vsel %vm1462_vm6, %v1399_v21, -1e+30 }
 0x354   : > { %1485 = vmax.xlane.f32.xlu0 %v1466_v24  ;;  %v2092_v26 = vpop.f32.mrb[28].mxu1  ;;  %v1465_v31 = vsel %vm1462_vm6, %v1394_v23, -1e+30 }
 0x355   : > { %v1403_v27 = vpop.f32.mrb[29].mxu1  ;;  %v1409_v30 = vadd.f32 %v2092_v26, %v1821_v13 }
 0x356   : > { %v1404_v29 = vadd.f32 %v1821_v13, %v1403_v27 }
 0x357   : > { %v1468_v36 = vsel %vm1462_vm6, %v1409_v30, -1e+30 }
 0x358   : > { %1483 = vmax.xlane.f32.xlu0 %v1465_v31  ;;  %v2095_v32 = vpop.f32.mrb[30].mxu1  ;;  %v1467_v28 = vsel %vm1462_vm6, %v1404_v29, -1e+30 }
 0x359   : > { %1487 = vmax.xlane.f32.xlu1 %v1467_v28  ;;  %v1413_v33 = vpop.f32.mrb[31].mxu1  ;;  %v1419_v35 = vadd.f32 %v2095_v32, %v1821_v13 }
 0x35a   : > { %v1414_v34 = vadd.f32 %v1821_v13, %v1413_v33 }
 0x35b   : > { %v1470_v42 = vsel %vm1462_vm6, %v1419_v35, -1e+30 }
 0x35c   : > { %1489 = vmax.xlane.f32.xlu0 %v1468_v36  ;;  %v2098_v37 = vpop.f32.mrb[32].mxu1  ;;  %v1469_v38 = vsel %vm1462_vm6, %v1414_v34, -1e+30 }
 0x35d   : > { %1491 = vmax.xlane.f32.xlu1 %v1469_v38  ;;  %v1423_v39 = vpop.f32.mrb[33].mxu1  ;;  %v1429_v41 = vadd.f32 %v2098_v37, %v1821_v13 }
 0x35e   : > { %v1424_v40 = vadd.f32 %v1821_v13, %v1423_v39 }
 0x35f   : > { %v2613_v48 = vsel %vm1462_vm6, %v1429_v41, -1e+30 }
 0x360   : > { %1493 = vmax.xlane.f32.xlu0 %v1470_v42  ;;  %v2101_v43 = vpop.f32.mrb[34].mxu1  ;;  %v1471_v44 = vsel %vm1462_vm6, %v1424_v40, -1e+30 }
 0x361   : > { %1495 = vmax.xlane.f32.xlu1 %v1471_v44  ;;  %v1433_v45 = vpop.f32.mrb[35].mxu1  ;;  %v1439_v47 = vadd.f32 %v2101_v43, %v1821_v13 }
 0x362   : > { %v1434_v46 = vadd.f32 %v1821_v13, %v1433_v45 }
 0x363   : > { %v2623_v54 = vsel %vm1462_vm6, %v1439_v47, -1e+30 }
 0x364   : > { %1497 = vmax.xlane.f32.xlu0 %v2613_v48  ;;  %v2104_v49 = vpop.f32.mrb[36].mxu1  ;;  %v2618_v50 = vsel %vm1462_vm6, %v1434_v46, -1e+30 }
 0x365   : > { %1499 = vmax.xlane.f32.xlu1 %v2618_v50  ;;  %v1443_v51 = vpop.f32.mrb[37].mxu1  ;;  %v1449_v53 = vadd.f32 %v2104_v49, %v1821_v13 }
 0x366   : > { %v1444_v52 = vadd.f32 %v1821_v13, %v1443_v51 }
 0x367   : > { %v2633_v60 = vsel %vm1462_vm6, %v1449_v53, -1e+30 }
 0x368   : > { %1501 = vmax.xlane.f32.xlu0 %v2623_v54  ;;  %v2107_v55 = vpop.f32.mrb[38].mxu1  ;;  %v2628_v56 = vsel %vm1462_vm6, %v1444_v52, -1e+30 }
 0x369   : > { %1503 = vmax.xlane.f32.xlu1 %v2628_v56  ;;  %v1453_v57 = vpop.f32.mrb[39].mxu1  ;;  %v1459_v59 = vadd.f32 %v2107_v55, %v1821_v13 }
 0x36a   : > { %v1454_v58 = vadd.f32 %v1821_v13, %v1453_v57 }
 0x36b   : > { %v2643_v62 = vsel %vm1462_vm6, %v1459_v59, -1e+30 }
 0x36c   : > { %1505 = vmax.xlane.f32.xlu0 %v2633_v60  ;;  %v2638_v61 = vsel %vm1462_vm6, %v1454_v58, -1e+30 }
 0x36d   : > { %1507 = vmax.xlane.f32.xlu1 %v2638_v61 }
 0x370   : > { %1509 = vmax.xlane.f32.xlu0 %v2643_v62 }
 0x3db   : > { %v1482_v63 = vpop.xlane.xlu1 %1481 }
 0x3dc   : > { %v2646_v0 = vsub.f32 %v1464_v18, %v1482_v63  ;;  %v1480_v1 = vpop.xlane.xlu0 %1479 }
 0x3dd   : > { %v2648_v2 = vsub.f32 %v1463_v19, %v1480_v1 }
 0x3de   : > { %v1529_v3 = vmul.f32 1.442695, %v2646_v0 }
 0x3df   : > { %v1527_v4 = vmul.f32 1.442695, %v2648_v2 }
 0x3e0   : > { %2207 = vpow2.f32 %v1529_v3 }
 0x3e1   : > { %2209 = vpow2.f32 %v1527_v4  ;;  %v1486_v5 = vpop.xlane.xlu0 %1485 }
 0x3e2   : > { %v2652_v6 = vsub.f32 %v1466_v24, %v1486_v5 }
 0x3e4   : > { %v1533_v25 = vmul.f32 1.442695, %v2652_v6 }
 0x3e5   : > { %v1484_v7 = vpop.xlane.xlu0 %1483 }
 0x3e6   : > { %2211 = vpow2.f32 %v1533_v25  ;;  %v2655_v8 = vsub.f32 %v1465_v31, %v1484_v7  ;;  %v1488_v9 = vpop.xlane.xlu1 %1487 }
 0x3e7   : > { %v2657_v10 = vsub.f32 %v1467_v28, %v1488_v9 }
 0x3e8   : > { %v1531_v11 = vmul.f32 1.442695, %v2655_v8 }
 0x3e9   : > { %v1535_v12 = vmul.f32 1.442695, %v2657_v10  ;;  %v1490_v13 = vpop.xlane.xlu0 %1489 }
 0x3ea   : > { %v2208_v14 = vpop.eup %2207  ;;  %2213 = vpow2.f32 %v1531_v11  ;;  %v2661_v15 = vsub.f32 %v1468_v36, %v1490_v13  ;;  %v1492_v16 = vpop.xlane.xlu1 %1491 }
 0x3eb   : > { %v2210_v17 = vpop.eup %2209  ;;  %v2663_v18 = vsub.f32 %v1469_v38, %v1492_v16  ;;  %1561 = vadd.xlane.f32.xlu0 %v2208_v14  ;;  %2215 = vpow2.f32 %v1535_v12 }
 0x3ec   : > { %v1537_v19 = vmul.f32 1.442695, %v2661_v15  ;;  %1559 = vadd.xlane.f32.xlu1 %v2210_v17 }
 0x3ed   : > { %v1539_v20 = vmul.f32 1.442695, %v2663_v18  ;;  %v1494_v21 = vpop.xlane.xlu0 %1493 }
 0x3ee   : > { %2217 = vpow2.f32 %v1537_v19  ;;  %v2667_v22 = vsub.f32 %v1470_v42, %v1494_v21  ;;  %v1496_v23 = vpop.xlane.xlu1 %1495 }
 0x3ef   : > { %v2669_v24 = vsub.f32 %v1471_v44, %v1496_v23  ;;  %2219 = vpow2.f32 %v1539_v20 }
 0x3f0   : > { %v2212_v26 = vpop.eup %2211  ;;  %v1541_v27 = vmul.f32 1.442695, %v2667_v22 }
 0x3f1   : > { %v1543_v29 = vmul.f32 1.442695, %v2669_v24  ;;  %v1498_v30 = vpop.xlane.xlu0 %1497  ;;  %1565 = vadd.xlane.f32.xlu0 %v2212_v26 }
 0x3f2   : > { %2221 = vpow2.f32 %v1541_v27  ;;  %v2674_v31 = vsub.f32 %v2613_v48, %v1498_v30  ;;  %v1500_v32 = vpop.xlane.xlu1 %1499 }
 0x3f3   : > { %v2677_v28 = vsub.f32 %v2618_v50, %v1500_v32  ;;  %2223 = vpow2.f32 %v1543_v29 }
 0x3f4   : > { %v2214_v33 = vpop.eup %2213  ;;  %v1545_v34 = vmul.f32 1.442695, %v2674_v31 }
 0x3f5   : > { %v1547_v35 = vmul.f32 1.442695, %v2677_v28  ;;  %v1502_v36 = vpop.xlane.xlu0 %1501  ;;  %1563 = vadd.xlane.f32.xlu1 %v2214_v33  ;;  %v2216_v39 = vpop.eup %2215 }
 0x3f6   : > { %2225 = vpow2.f32 %v1545_v34  ;;  %v2682_v37 = vsub.f32 %v2623_v54, %v1502_v36  ;;  %v1504_v38 = vpop.xlane.xlu1 %1503 }
 0x3f7   : > { %v2685_v40 = vsub.f32 %v2628_v56, %v1504_v38  ;;  %2227 = vpow2.f32 %v1547_v35 }
 0x3f8   : > { %v2218_v41 = vpop.eup %2217  ;;  %v1549_v42 = vmul.f32 1.442695, %v2682_v37 }
 0x3f9   : > { %v1551_v43 = vmul.f32 1.442695, %v2685_v40  ;;  %v1506_v44 = vpop.xlane.xlu0 %1505  ;;  %1569 = vadd.xlane.f32.xlu0 %v2218_v41  ;;  %1567 = vadd.xlane.f32.xlu1 %v2216_v39  ;;  %v2220_v47 = vpop.eup %2219 }
 0x3fa   : > { %2229 = vpow2.f32 %v1549_v42  ;;  %v2690_v45 = vsub.f32 %v2633_v60, %v1506_v44  ;;  %v1508_v46 = vpop.xlane.xlu1 %1507 }
 0x3fb   : > { %v2693_v48 = vsub.f32 %v2638_v61, %v1508_v46  ;;  %2231 = vpow2.f32 %v1551_v43 }
 0x3fc   : > { %v2222_v49 = vpop.eup %2221  ;;  %v1553_v50 = vmul.f32 1.442695, %v2690_v45 }
 0x3fd   : > { %v1555_v51 = vmul.f32 1.442695, %v2693_v48  ;;  %1573 = vadd.xlane.f32.xlu0 %v2222_v49  ;;  %v1510_v52 = vpop.xlane.xlu0 %1509  ;;  %1571 = vadd.xlane.f32.xlu1 %v2220_v47  ;;  %v2224_v54 = vpop.eup %2223 }
 0x3fe   : > { %2233 = vpow2.f32 %v1553_v50  ;;  %v2698_v53 = vsub.f32 %v2643_v62, %v1510_v52 }
 0x3ff   : > { %2235 = vpow2.f32 %v1555_v51 }
 0x400   : > { %v2226_v55 = vpop.eup %2225  ;;  %v1557_v56 = vmul.f32 1.442695, %v2698_v53 }
 0x401   : > { %1577 = vadd.xlane.f32.xlu0 %v2226_v55  ;;  %1575 = vadd.xlane.f32.xlu1 %v2224_v54  ;;  %v2228_v57 = vpop.eup %2227 }
 0x402   : > { %2237 = vpow2.f32 %v1557_v56 }
 0x404   : > { %v2230_v58 = vpop.eup %2229 }
 0x405   : > { %1581 = vadd.xlane.f32.xlu0 %v2230_v58  ;;  %1579 = vadd.xlane.f32.xlu1 %v2228_v57  ;;  %v2232_v59 = vpop.eup %2231 }
 0x408   : > { %v2234_v60 = vpop.eup %2233 }
 0x409   : > { %1585 = vadd.xlane.f32.xlu0 %v2234_v60  ;;  %1583 = vadd.xlane.f32.xlu1 %v2232_v59  ;;  %v2236_v61 = vpop.eup %2235 }
 0x40c   : > { %v2238_v62 = vpop.eup %2237 }
 0x40d   : > { %1589 = vadd.xlane.f32.xlu0 %v2238_v62  ;;  %1587 = vadd.xlane.f32.xlu1 %v2236_v61 }
 0x478   : > { %v1562_v63 = vpop.xlane.xlu0 %1561 }
 0x479   : > { %2239 = vlog2.f32 %v1562_v63  ;;  %v1560_v1 = vpop.xlane.xlu1 %1559 }
 0x47a   : > { %2241 = vlog2.f32 %v1560_v1 }
 0x47e   : > { %v1566_v3 = vpop.xlane.xlu0 %1565 }
 0x47f   : > { %2243 = vlog2.f32 %v1566_v3 }
 0x482   : > { %v1564_v4 = vpop.xlane.xlu1 %1563 }
 0x483   : > { %v2240_v5 = vpop.eup %2239  ;;  %2245 = vlog2.f32 %v1564_v4 }
 0x484   : > { %v2242_v25 = vpop.eup %2241  ;;  %v1594_v7 = vmul.f32 0.6931472, %v2240_v5 }
 0x485   : > { %v1592_v9 = vmul.f32 0.6931472, %v2242_v25 }
 0x486   : > { %v1624_v11 = vsub.f32 %v2646_v0, %v1594_v7  ;;  %v1570_v12 = vpop.xlane.xlu0 %1569  ;;  %v1568_v13 = vpop.xlane.xlu1 %1567 }
 0x487   : > { %v1623_v14 = vsub.f32 %v2648_v2, %v1592_v9  ;;  %2247 = vlog2.f32 %v1570_v12 }
 0x488   : > { %1640 = vst [vmem:[%s2706_s16 + $0x8] sm:$0xff] %v1624_v11  ;;  %2249 = vlog2.f32 %v1568_v13 }
 0x489   : > { %v2244_v16 = vpop.eup %2243  ;;  %1639 = vst [vmem:[%s2706_s16] sm:$0xff] %v1623_v14 }
 0x48a   : > { %v1598_v17 = vmul.f32 0.6931472, %v2244_v16  ;;  %v1574_v19 = vpop.xlane.xlu0 %1573  ;;  %v1572_v20 = vpop.xlane.xlu1 %1571 }
 0x48b   : > { %2251 = vlog2.f32 %v1574_v19 }
 0x48c   : > { %v1626_v21 = vsub.f32 %v2652_v6, %v1598_v17  ;;  %2253 = vlog2.f32 %v1572_v20 }
 0x48d   : > { %v2246_v23 = vpop.eup %2245 }
 0x48e   : > { %1642 = vst [vmem:[%s2706_s16 + $0x18] sm:$0xff] %v1626_v21  ;;  %v1596_v0 = vmul.f32 0.6931472, %v2246_v23  ;;  %v1578_v26 = vpop.xlane.xlu0 %1577  ;;  %v1576_v27 = vpop.xlane.xlu1 %1575 }
 0x48f   : > { %2255 = vlog2.f32 %v1578_v26 }
 0x490   : > { %v1625_v2 = vsub.f32 %v2655_v8, %v1596_v0  ;;  %2257 = vlog2.f32 %v1576_v27 }
 0x491   : > { %v2248_v29 = vpop.eup %2247 }
 0x492   : > { %v2250_v30 = vpop.eup %2249  ;;  %1641 = vst [vmem:[%s2706_s16 + $0x10] sm:$0xff] %v1625_v2  ;;  %v1602_v32 = vmul.f32 0.6931472, %v2248_v29  ;;  %v1582_v33 = vpop.xlane.xlu0 %1581 }
 0x493   : > { %v1580_v34 = vpop.xlane.xlu1 %1579  ;;  %v1600_v35 = vmul.f32 0.6931472, %v2250_v30  ;;  %2259 = vlog2.f32 %v1582_v33 }
 0x494   : > { %v1628_v6 = vsub.f32 %v2661_v15, %v1602_v32  ;;  %2261 = vlog2.f32 %v1580_v34 }
 0x495   : > { %v2252_v36 = vpop.eup %2251  ;;  %v1627_v38 = vsub.f32 %v2657_v10, %v1600_v35 }
 0x496   : > { %v2254_v39 = vpop.eup %2253  ;;  %1644 = vst [vmem:[%s2706_s16 + $0x28] sm:$0xff] %v1628_v6  ;;  %v1606_v8 = vmul.f32 0.6931472, %v2252_v36  ;;  %v1586_v41 = vpop.xlane.xlu0 %1585 }
 0x497   : > { %v1584_v42 = vpop.xlane.xlu1 %1583  ;;  %1643 = vst [vmem:[%s2706_s16 + $0x20] sm:$0xff] %v1627_v38  ;;  %v1604_v43 = vmul.f32 0.6931472, %v2254_v39  ;;  %2263 = vlog2.f32 %v1586_v41 }
 0x498   : > { %v1630_v44 = vsub.f32 %v2667_v22, %v1606_v8  ;;  %2265 = vlog2.f32 %v1584_v42 }
 0x499   : > { %v2256_v46 = vpop.eup %2255  ;;  %v1629_v15 = vsub.f32 %v2663_v18, %v1604_v43 }
 0x49a   : > { %v2258_v47 = vpop.eup %2257  ;;  %1646 = vst [vmem:[%s2706_s16 + $0x38] sm:$0xff] %v1630_v44  ;;  %v1610_v10 = vmul.f32 0.6931472, %v2256_v46  ;;  %v1590_v49 = vpop.xlane.xlu0 %1589 }
 0x49b   : > { %v1588_v50 = vpop.xlane.xlu1 %1587  ;;  %1645 = vst [vmem:[%s2706_s16 + $0x30] sm:$0xff] %v1629_v15  ;;  %v1608_v51 = vmul.f32 0.6931472, %v2258_v47  ;;  %2267 = vlog2.f32 %v1590_v49 }
 0x49c   : > { %v1632_v52 = vsub.f32 %v2674_v31, %v1610_v10  ;;  %2269 = vlog2.f32 %v1588_v50 }
 0x49d   : > { %v2260_v22 = vpop.eup %2259  ;;  %v1631_v54 = vsub.f32 %v2669_v24, %v1608_v51 }
 0x49e   : > { %v2262_v55 = vpop.eup %2261  ;;  %1648 = vst [vmem:[%s2706_s16 + $0x48] sm:$0xff] %v1632_v52  ;;  %v1614_v18 = vmul.f32 0.6931472, %v2260_v22 }
 0x49f   : > { %1647 = vst [vmem:[%s2706_s16 + $0x40] sm:$0xff] %v1631_v54  ;;  %v1612_v56 = vmul.f32 0.6931472, %v2262_v55 }
 0x4a0   : > { %v1634_v57 = vsub.f32 %v2682_v37, %v1614_v18 }
 0x4a1   : > { %v2264_v58 = vpop.eup %2263  ;;  %v1633_v59 = vsub.f32 %v2677_v28, %v1612_v56 }
 0x4a2   : > { %v2266_v60 = vpop.eup %2265  ;;  %1650 = vst [vmem:[%s2706_s16 + $0x58] sm:$0xff] %v1634_v57  ;;  %v1618_v31 = vmul.f32 0.6931472, %v2264_v58 }
 0x4a3   : > { %1649 = vst [vmem:[%s2706_s16 + $0x50] sm:$0xff] %v1633_v59  ;;  %v1616_v61 = vmul.f32 0.6931472, %v2266_v60 }
 0x4a4   : > { %v1636_v24 = vsub.f32 %v2690_v45, %v1618_v31 }
 0x4a5   : > { %v2268_v62 = vpop.eup %2267  ;;  %v1635_v63 = vsub.f32 %v2685_v40, %v1616_v61 }
 0x4a6   : > { %v2270_v1 = vpop.eup %2269  ;;  %1652 = vst [vmem:[%s2706_s16 + $0x68] sm:$0xff] %v1636_v24  ;;  %v1622_v3 = vmul.f32 0.6931472, %v2268_v62 }
 0x4a7   : > { %1651 = vst [vmem:[%s2706_s16 + $0x60] sm:$0xff] %v1635_v63  ;;  %v1620_v37 = vmul.f32 0.6931472, %v2270_v1 }
 0x4a8   : > { %v1638_v4 = vsub.f32 %v2698_v53, %v1622_v3 }
 0x4a9   : > { %v1637_v28 = vsub.f32 %v2693_v48, %v1620_v37 }
 0x4aa   : > { %1654 = vst [vmem:[%s2706_s16 + $0x78] sm:$0xff] %v1638_v4 }
 0x4ab   : > { %1653 = vst [vmem:[%s2706_s16 + $0x70] sm:$0xff] %v1637_v28 }
 0x4ac PF: > { %s16_s21 = sadd.s32 1, %s2277_s21  }
 0x4ad   : > { %p13_p4 = scmp.ge.s32.totalorder %s16_s21, 4  }
 0x4af   :  { %15 = sbr.rel (!%p13_p4) target bundleno = 1 (0x1), region = 75 }

</bundles_post_ra>
